<compile_context>
chip_gen: v5e
topology: v5e:2x2
jax: 0.10.0
libtpu: 0.0.40
codegen_flags: <defaults>
</compile_context>

<pallas_src>
import functools

import jax
import jax.numpy as jnp
from jax.experimental import pallas as pl
from jax.experimental.pallas import tpu as pltpu

_SLOPE = 0.2                              # LeakyReLU negative_slope
_VMEM_LIMIT_BYTES = 48 * 1024 * 1024      # scoped VMEM limit (safe on v5e/v6e/v7x)
_VMEM_TILE_BUDGET = 32 * 1024 * 1024      # byte budget used to derive the row tile


def _leaky(x):
    # slope in (0, 1) => leaky_relu(x) == max(x, slope*x)
    return jnp.maximum(x, _SLOPE * x)


def _mask_rows(v, tile_m, n_valid):
    """Zero rows of the current tile that fall beyond the real row count."""
    rows = pl.program_id(0) * tile_m + jax.lax.broadcasted_iota(
        jnp.int32, (tile_m, 1), 0)
    return jnp.where(rows < n_valid, v, jnp.zeros_like(v))


# ---------------------------------------------------------------------------
# Pass 1: per-channel sum / sum-of-squares of [h | r] = x @ [W1^T | Wr^T]
# (single fused matmul; identity case simply has no Wr columns).
# Per-tile partial sums are written out and reduced in the wrapper.
# ---------------------------------------------------------------------------
def _stats1_kernel(x_ref, wct_ref, s_ref, sq_ref, *, tile_m, n_valid, need_mask):
    x = x_ref[...].astype(wct_ref.dtype)
    if need_mask:
        x = _mask_rows(x, tile_m, n_valid)        # garbage rows contribute zero
    hr = jnp.dot(x, wct_ref[...], preferred_element_type=jnp.float32)
    s_ref[0] = jnp.sum(hr, axis=0, keepdims=True)
    sq_ref[0] = jnp.sum(hr * hr, axis=0, keepdims=True)


# ---------------------------------------------------------------------------
# Pass 2: stats of z = leaky(bn1(x @ W1^T)) @ W2^T   (h recomputed, not re-read).
# Garbage / padded rows are nonzero after the BN bias, so mask h before W2.
# ---------------------------------------------------------------------------
def _stats2_kernel(x_ref, w1t_ref, sc1_ref, bi1_ref, w2t_ref,
                   zs_ref, zq_ref, *, tile_m, n_valid, need_mask):
    x = x_ref[...].astype(w1t_ref.dtype)
    h = jnp.dot(x, w1t_ref[...], preferred_element_type=jnp.float32)
    h = _leaky(h * sc1_ref[...] + bi1_ref[...])
    if need_mask:
        h = _mask_rows(h, tile_m, n_valid)
    z = jnp.dot(h.astype(w2t_ref.dtype), w2t_ref[...],
                preferred_element_type=jnp.float32)
    zs_ref[0] = jnp.sum(z, axis=0, keepdims=True)
    zq_ref[0] = jnp.sum(z * z, axis=0, keepdims=True)


# ---------------------------------------------------------------------------
# Pass 3: fused final output (both branches recomputed from x, one HBM write).
# Ragged last-tile rows are dropped by the masked output store.
# ---------------------------------------------------------------------------
def _final_rescale_kernel(x_ref, w1t_ref, sc1_ref, bi1_ref,
                          w2t_ref, sc2_ref, bi2_ref,
                          wrt_ref, scr_ref, bir_ref, o_ref):
    x = x_ref[...].astype(w1t_ref.dtype)
    h = _leaky(jnp.dot(x, w1t_ref[...], preferred_element_type=jnp.float32)
               * sc1_ref[...] + bi1_ref[...])
    z = _leaky(jnp.dot(h.astype(w2t_ref.dtype), w2t_ref[...],
                       preferred_element_type=jnp.float32)
               * sc2_ref[...] + bi2_ref[...])
    r = _leaky(jnp.dot(x, wrt_ref[...], preferred_element_type=jnp.float32)
               * scr_ref[...] + bir_ref[...])
    o_ref[...] = (z + r).astype(o_ref.dtype)


def _final_identity_kernel(x_ref, w1t_ref, sc1_ref, bi1_ref,
                           w2t_ref, sc2_ref, bi2_ref, o_ref):
    xr = x_ref[...]
    x = xr.astype(w1t_ref.dtype)
    h = _leaky(jnp.dot(x, w1t_ref[...], preferred_element_type=jnp.float32)
               * sc1_ref[...] + bi1_ref[...])
    z = _leaky(jnp.dot(h.astype(w2t_ref.dtype), w2t_ref[...],
                       preferred_element_type=jnp.float32)
               * sc2_ref[...] + bi2_ref[...])
    o_ref[...] = (z + xr.astype(jnp.float32)).astype(o_ref.dtype)


# ---------------------------------------------------------------------------
# Wrapper
# ---------------------------------------------------------------------------
def _round_up(a, b):
    return (a + b - 1) // b * b


def _bn_fold(s, sq, gamma, beta, m, eps):
    """Fold batch-stat normalization + affine into per-channel (scale, bias)."""
    mean = s / m
    var = jnp.maximum(sq / m - mean * mean, 0.0)   # biased variance, clamped
    scale = gamma.reshape(1, -1).astype(jnp.float32) * jax.lax.rsqrt(var + eps)
    bias = beta.reshape(1, -1).astype(jnp.float32) - mean * scale
    return scale, bias


def _pick_tile(M, C_in, H, C_out, wide, x_bytes, c_bytes, tile_cap):
    """Largest row tile (multiple of 16) whose live VMEM fits the byte budget."""
    # Conservative per-row superset over the three passes (double-buffered streams
    # plus f32 intermediates) and a fixed term for the (double-buffered) weights.
    per_row = (2 * C_in + 2 * C_out) * x_bytes + 8 * wide + (4 + c_bytes) * H \
              + 8 * C_out
    fixed = 4 * c_bytes * (C_in * wide + H * C_out) + 64 * 4 * wide
    rows = max((_VMEM_TILE_BUDGET - fixed) // max(per_row, 1), 16)
    tm = min(tile_cap, rows, _round_up(M, 16))
    return max(16, (tm // 16) * 16)


def residual_basic_point_layer(x, w1, bn1_g, bn1_b, w2, bn2_g, bn2_b,
                               wr=None, bnr_g=None, bnr_b=None,
                               *, eps=1e-5, tile_m=1024):
    B, N, C_in = x.shape
    H = w1.shape[0]
    C_out = w2.shape[0]
    has_rescale = wr is not None
    if not has_rescale:
        assert C_in == C_out, "identity residual requires C_in == C_out"

    M = B * N
    xf = x.reshape(M, C_in)                     # free reshape, never copied/up-cast

    f32 = jnp.float32
    # Matmul operand dtype: keep bf16 inputs in bf16 (f32 accumulation on the MXU).
    cdt = jnp.bfloat16 if x.dtype == jnp.bfloat16 else f32

    w1t = w1.reshape(H, C_in).T.astype(cdt)     # (C_in, H)
    w2t = w2.reshape(C_out, H).T.astype(cdt)    # (H, C_out)
    if has_rescale:
        wrt = wr.reshape(C_out, C_in).T.astype(cdt)          # (C_in, C_out)
        wct = jnp.concatenate([w1t, wrt], axis=1)            # (C_in, H + C_out)
    else:
        wrt = None
        wct = w1t
    wide = wct.shape[1]

    tm = _pick_tile(M, C_in, H, C_out, wide,
                    jnp.dtype(x.dtype).itemsize, jnp.dtype(cdt).itemsize, tile_m)
    grid_m = pl.cdiv(M, tm)
    need_mask = (M % tm) != 0                   # only then is any masking emitted
    grid = (grid_m,)

    row_spec = pl.BlockSpec((tm, C_in), lambda i: (i, 0))
    const2 = lambda shape: pl.BlockSpec(shape, lambda i: (0, 0))   # resident operands
    part3 = lambda c: pl.BlockSpec((1, 1, c), lambda i: (i, 0, 0))  # per-tile partials
    params = pltpu.CompilerParams(dimension_semantics=("parallel",),
                                  vmem_limit_bytes=_VMEM_LIMIT_BYTES)

    # ---- Pass 1: stats for BN1 (and BN_rescale), fused x-LHS matmul -----------
    s_p, sq_p = pl.pallas_call(
        functools.partial(_stats1_kernel, tile_m=tm, n_valid=M, need_mask=need_mask),
        out_shape=(jax.ShapeDtypeStruct((grid_m, 1, wide), f32),
                   jax.ShapeDtypeStruct((grid_m, 1, wide), f32)),
        grid=grid,
        in_specs=[row_spec, const2((C_in, wide))],
        out_specs=(part3(wide), part3(wide)),
        compiler_params=params,
    )(xf, wct)
    s = jnp.sum(s_p, axis=0)                    # (1, wide) f32
    sq = jnp.sum(sq_p, axis=0)

    sc1, bi1 = _bn_fold(s[:, :H], sq[:, :H], bn1_g, bn1_b, M, eps)

    # ---- Pass 2: stats for BN2 (h recomputed in-kernel) -----------------------
    zs_p, zq_p = pl.pallas_call(
        functools.partial(_stats2_kernel, tile_m=tm, n_valid=M, need_mask=need_mask),
        out_shape=(jax.ShapeDtypeStruct((grid_m, 1, C_out), f32),
                   jax.ShapeDtypeStruct((grid_m, 1, C_out), f32)),
        grid=grid,
        in_specs=[row_spec, const2((C_in, H)), const2((1, H)), const2((1, H)),
                  const2((H, C_out))],
        out_specs=(part3(C_out), part3(C_out)),
        compiler_params=params,
    )(xf, w1t, sc1, bi1, w2t)
    sc2, bi2 = _bn_fold(jnp.sum(zs_p, axis=0), jnp.sum(zq_p, axis=0),
                        bn2_g, bn2_b, M, eps)

    # ---- Pass 3: fused final output (exact (M, C_out); no pad / slice copy) ----
    out_spec = pl.BlockSpec((tm, C_out), lambda i: (i, 0))
    if has_rescale:
        scr, bir = _bn_fold(s[:, H:], sq[:, H:], bnr_g, bnr_b, M, eps)
        out = pl.pallas_call(
            _final_rescale_kernel,
            out_shape=jax.ShapeDtypeStruct((M, C_out), x.dtype),
            grid=grid,
            in_specs=[row_spec, const2((C_in, H)), const2((1, H)), const2((1, H)),
                      const2((H, C_out)), const2((1, C_out)), const2((1, C_out)),
                      const2((C_in, C_out)), const2((1, C_out)), const2((1, C_out))],
            out_specs=out_spec,
            compiler_params=params,
        )(xf, w1t, sc1, bi1, w2t, sc2, bi2, wrt, scr, bir)
    else:
        out = pl.pallas_call(
            _final_identity_kernel,
            out_shape=jax.ShapeDtypeStruct((M, C_out), x.dtype),
            grid=grid,
            in_specs=[row_spec, const2((C_in, H)), const2((1, H)), const2((1, H)),
                      const2((H, C_out)), const2((1, C_out)), const2((1, C_out))],
            out_specs=out_spec,
            compiler_params=params,
        )(xf, w1t, sc1, bi1, w2t, sc2, bi2)

    return out.reshape(B, N, C_out)


# ---------------------------------------------------------------------------
# Pure-JAX reference mirroring the PyTorch eval-mode forward.
# ---------------------------------------------------------------------------
def residual_basic_point_layer_ref(x, w1, bn1_g, bn1_b, w2, bn2_g, bn2_b,
                                   wr=None, bnr_g=None, bnr_b=None, eps=1e-5):
    B, N, C_in = x.shape
    H = w1.shape[0]
    C_out = w2.shape[0]
    xf = x.reshape(B * N, C_in).astype(jnp.float32)

    def bn(z, g, b):
        mean = jnp.mean(z, axis=0, keepdims=True)
        var = jnp.mean((z - mean) ** 2, axis=0, keepdims=True)
        return (z - mean) * jax.lax.rsqrt(var + eps) * g.reshape(1, -1) + b.reshape(1, -1)

    def lrelu(z):
        return jnp.where(z >= 0, z, _SLOPE * z)

    h = lrelu(bn(xf @ w1.reshape(H, C_in).T, bn1_g, bn1_b))
    z = lrelu(bn(h @ w2.reshape(C_out, H).T, bn2_g, bn2_b))
    if wr is None:
        r = xf
    else:
        r = lrelu(bn(xf @ wr.reshape(C_out, C_in).T, bnr_g, bnr_b))
    return (z + r).reshape(B, N, C_out).astype(x.dtype)


if __name__ == "__main__":
    key = jax.random.PRNGKey(0)
    k0, k1, k2, k3, k4, k5 = jax.random.split(key, 6)

    # ---- Case 1: C_in != C_out -> rescale branch active; multi-tile grid -------
    B, N, C_in, H, C_out = 2, 256, 32, 64, 64          # M = 512 rows
    x = jax.random.normal(k0, (B, N, C_in), dtype=jnp.float32)
    # Conv1d(k=1, bias=False) weights: (out_channels, in_channels, 1)
    w1 = jax.random.normal(k1, (H, C_in, 1), dtype=jnp.float32) / jnp.sqrt(C_in)
    w2 = jax.random.normal(k2, (C_out, H, 1), dtype=jnp.float32) / jnp.sqrt(H)
    wr = jax.random.normal(k3, (C_out, C_in, 1), dtype=jnp.float32) / jnp.sqrt(C_in)
    # BatchNorm1d default affine init: gamma = 1, beta = 0
    bn1_g = jnp.ones((H,), jnp.float32); bn1_b = jnp.zeros((H,), jnp.float32)
    bn2_g = jnp.ones((C_out,), jnp.float32); bn2_b = jnp.zeros((C_out,), jnp.float32)
    bnr_g = jnp.ones((C_out,), jnp.float32); bnr_b = jnp.zeros((C_out,), jnp.float32)

    out = residual_basic_point_layer(x, w1, bn1_g, bn1_b, w2, bn2_g, bn2_b,
                                     wr, bnr_g, bnr_b, tile_m=128)
    out = jax.block_until_ready(out)
    ref = residual_basic_point_layer_ref(x, w1, bn1_g, bn1_b, w2, bn2_g, bn2_b,
                                         wr, bnr_g, bnr_b)
    assert out.shape == (B, N, C_out) and out.dtype == x.dtype
    assert jnp.allclose(out, ref, rtol=2e-3, atol=2e-3), "rescale case mismatch"

    # ---- Case 2: C_in == C_out -> identity residual; ragged last tile ----------
    B2, N2, C2, H2 = 2, 300, 64, 64                    # M = 600, tm = 256 -> ragged
    x2 = jax.random.normal(k4, (B2, N2, C2), dtype=jnp.float32)
    w1b = jax.random.normal(k5, (H2, C2, 1), dtype=jnp.float32) / jnp.sqrt(C2)
    w2b = jax.random.normal(k1, (C2, H2, 1), dtype=jnp.float32) / jnp.sqrt(H2)
    g1 = jnp.ones((H2,), jnp.float32); b1 = jnp.zeros((H2,), jnp.float32)
    g2 = jnp.ones((C2,), jnp.float32); b2 = jnp.zeros((C2,), jnp.float32)

    out2 = residual_basic_point_layer(x2, w1b, g1, b1, w2b, g2, b2, tile_m=256)
    out2 = jax.block_until_ready(out2)
    ref2 = residual_basic_point_layer_ref(x2, w1b, g1, b1, w2b, g2, b2)
    assert out2.shape == (B2, N2, C2) and out2.dtype == x2.dtype
    assert jnp.allclose(out2, ref2, rtol=2e-3, atol=2e-3), "identity case mismatch"

    print("KERNEL_OK")
</pallas_src>

<mosaic_0001>
module attributes {stable_mosaic.version = 11 : i64} {
  func.func @_stats1_kernel(%arg0: i32, %arg1: memref<128x32xf32, #tpu.memory_space<vmem>>, %arg2: memref<32x128xf32, #tpu.memory_space<vmem>>, %arg3: memref<1x1x128xf32, #tpu.memory_space<vmem>>, %arg4: memref<1x1x128xf32, #tpu.memory_space<vmem>>) attributes {dimension_semantics = [#tpu.dimension_semantics<parallel>], iteration_bounds = array<i64: 4>, scalar_prefetch = 0 : i64, scratch_operands = 0 : i64, tpu.core_type = #tpu.core_type<tc>, window_params = [{transform_indices = @transform_0, window_bounds = array<i64: 128, 32>}, {pipeline_mode = #tpu.pipeline_mode<synchronous>, transform_indices = @transform_1, window_bounds = array<i64: 32, 128>}, {transform_indices = @transform_2, window_bounds = array<i64: 1, 1, 128>}, {transform_indices = @transform_3, window_bounds = array<i64: 1, 1, 128>}]} {
    %c0 = arith.constant 0 : index
    %c0_0 = arith.constant 0 : index
    %0 = vector.load %arg1[%c0, %c0_0] : memref<128x32xf32, #tpu.memory_space<vmem>>, vector<128x32xf32>
    %c0_1 = arith.constant 0 : index
    %c0_2 = arith.constant 0 : index
    %1 = vector.load %arg2[%c0_1, %c0_2] : memref<32x128xf32, #tpu.memory_space<vmem>>, vector<32x128xf32>
    %cst = arith.constant dense<0.000000e+00> : vector<128x128xf32>
    %2 = tpu.matmul %0, %1, %cst {dimension_numbers = #tpu.dot_dimension_numbers<[1], [0], [0], [1], [0, 0, 1, 1], [], []>} : vector<128x32xf32>, vector<32x128xf32>, vector<128x128xf32> -> vector<128x128xf32>
    %cst_3 = arith.constant dense<0.000000e+00> : vector<128xf32>
    %3 = vector.multi_reduction <add>, %2, %cst_3 [0] : vector<128x128xf32> to vector<128xf32>
    %4 = vector.shape_cast %3 : vector<128xf32> to vector<1x128xf32>
    %c0_4 = arith.constant 0 : index
    %c0_5 = arith.constant 0 : index
    %c0_6 = arith.constant 0 : index
    %5 = vector.load %arg3[%c0_4, %c0_5, %c0_6] : memref<1x1x128xf32, #tpu.memory_space<vmem>>, vector<1x1x128xf32>
    %6 = vector.shape_cast %5 : vector<1x1x128xf32> to vector<1x128xf32>
    %7 = vector.shape_cast %4 : vector<1x128xf32> to vector<1x1x128xf32>
    tpu.vector_store %arg3[%c0_4, %c0_5, %c0_6], %7 {strides = array<i32>} : memref<1x1x128xf32, #tpu.memory_space<vmem>>, vector<1x1x128xf32>,
    %8 = arith.mulf %2, %2 : vector<128x128xf32>
    %cst_7 = arith.constant dense<0.000000e+00> : vector<128xf32>
    %9 = vector.multi_reduction <add>, %8, %cst_7 [0] : vector<128x128xf32> to vector<128xf32>
    %10 = vector.shape_cast %9 : vector<128xf32> to vector<1x128xf32>
    %c0_8 = arith.constant 0 : index
    %c0_9 = arith.constant 0 : index
    %c0_10 = arith.constant 0 : index
    %11 = vector.load %arg4[%c0_8, %c0_9, %c0_10] : memref<1x1x128xf32, #tpu.memory_space<vmem>>, vector<1x1x128xf32>
    %12 = vector.shape_cast %11 : vector<1x1x128xf32> to vector<1x128xf32>
    %13 = vector.shape_cast %10 : vector<1x128xf32> to vector<1x1x128xf32>
    tpu.vector_store %arg4[%c0_8, %c0_9, %c0_10], %13 {strides = array<i32>} : memref<1x1x128xf32, #tpu.memory_space<vmem>>, vector<1x1x128xf32>,
    return
  }
  func.func @transform_0(%arg0: i32) -> (i32, i32) {
    %c0_i32 = arith.constant 0 : i32
    %c0_i32_0 = arith.constant 0 : i32
    return %arg0, %c0_i32 : i32, i32
  }
  func.func @transform_1(%arg0: i32) -> (i32, i32) {
    %c0_i32 = arith.constant 0 : i32
    %c0_i32_0 = arith.constant 0 : i32
    %c0_i32_1 = arith.constant 0 : i32
    return %c0_i32, %c0_i32_0 : i32, i32
  }
  func.func @transform_2(%arg0: i32) -> (i32, i32, i32) {
    %c0_i32 = arith.constant 0 : i32
    %c0_i32_0 = arith.constant 0 : i32
    %c0_i32_1 = arith.constant 0 : i32
    return %arg0, %c0_i32, %c0_i32_0 : i32, i32, i32
  }
  func.func @transform_3(%arg0: i32) -> (i32, i32, i32) {
    %c0_i32 = arith.constant 0 : i32
    %c0_i32_0 = arith.constant 0 : i32
    %c0_i32_1 = arith.constant 0 : i32
    return %arg0, %c0_i32, %c0_i32_0 : i32, i32, i32
  }
}

</mosaic_0001>

<bundles_post_ra>
// kernel: tpu_custom_call.1
= control target key start
LH: loop header
LB: loop body
LE: loop exit
PB: predicated region body
PF: predicated region fallthrough
CT: control target
= control target key end

     0   :  { %9 = vsyncpa [#allocation3], 0  ;;  %s851_s0 = inlined_call_operand.vmem [shape: f32[512,32], index: 0, kind: input, shape index: {}]   ;;  %s852_s1 = inlined_call_operand.vmem [shape: f32[32,128], index: 1, kind: input, shape index: {}]   ;;  %s853_s2 = inlined_call_operand.hbm [shape: f32[4,1,128], index: 2, kind: output, shape index: {0}]   ;;  %s854_s3 = inlined_call_operand.hbm [shape: f32[4,1,128], index: 3, kind: output, shape index: {1}]  }
   0x1   :  { %11 = vsyncpa [#allocation3 + $0x1], 0 }
   0x2   :  { %12 = vsyncpa [#allocation5], 0 }
   0x3   :  { %14 = vsyncpa [#allocation5 + $0x1], 0  ;;  %s683_s12 = smov 0   ;;  %s685_s13 = smov 0  }
   0x4   :  { %s687_s14 = smov 0   ;;  %s689_s15 = smov 0  }
   0x5 LB: > { %s704_s16 = sadd.s32 4294967295, %s661_s15   ;;  %s487_s17 = sadd.s32 4294967294, %s661_s15   ;;  %s661_s15 = sphi %s689_s15, %s860_s15   ;;  %s657_s14 = sphi %s687_s14, %s859_s14   ;;  %s653_s13 = sphi %s685_s13, %s858_s13   ;;  %s649_s12 = sphi %s683_s12, %s857_s12  }
   0x6   : > { %s708_s18 = sadd.s32 1, %s661_s15   ;;  %s74_s19 = sadd.s32 1, %s657_s14 }
   0x7   : > { %s71_s20 = ssub.s32 %s661_s15, %s708_s18  ;;  %p84_p0 = scmp.ne.s32.totalorder %s657_s14, %s653_s13 }
   0x8   : > { %p72_p1 = scmp.eq.s32.totalorder %s71_s20, 0  ;;  %p85_p2 = scmp.eq.s32.totalorder %s704_s16, 3 }
   0x9   : > { %p90_p3 = scmp.ne.s32.totalorder %s653_s13, %s649_s12  ;;  %p91_p4 = scmp.eq.s32.totalorder %s487_s17, 3 }
   0xa   : > { %s719_s21 = scalar_select %p72_p1, %s657_s14, %s74_s19  }
   0xb   : > { %p721_p5 = por %p85_p2, %p84_p0  ;;  %p725_p6 = por %p91_p4, %p90_p3 }
   0xc   : > { %p490_p7 = scmp.ge.s32.totalorder %s661_s15, 1  ;;  %p147_p8 = scmp.lt.s32.totalorder %s661_s15, 5 }
   0xe   : > { %p148_p9 = pnand %p490_p7, %p147_p8 }
   0xf   : > { %s491_s28 = sshll.u32 (!%p148_p9), %s704_s16, 4  ;;  %s782_s10 = sand.u32 (!%p148_p9), 1, %s653_s13  }
  0x10   : > { %151 = sbr.rel (%p148_p9) target bundleno = 232 (0xe8), region = 28  ;;  %p175_p10 = scmp.lt.s32.totalorder (!%p148_p9), %s491_s28, 63 }
  0x11   : > { %s387_s19 = scalar_lea.hbm (!%p148_p9), %s853_s2, %s704_s16  ;;  %s400_s25 = scalar_lea.hbm (!%p148_p9), %s854_s3, %s704_s16 }
  0x12   : > { %s167_s26 = scalar_lea.vmem (!%p148_p9), [#allocation2], %s782_s10  ;;  %s173_s29 = scalar_lea.vmem (!%p148_p9), [#allocation4], %s782_s10 }
  0x13   : > { %s793_s27 = sshll.u32 (!%p148_p9), %s167_s26, 4  ;;  %s798_s30 = sshll.u32 (!%p148_p9), %s173_s29, 4  ;;  %s390_s27 = int_to_ptr.vmem [resolvable:$true] %s793_s27  ;;  %s403_s30 = int_to_ptr.vmem [resolvable:$true] %s798_s30 }
  0x14   : > { %s800_s4 = sshll.u32 (!%p148_p9), %s400_s25, 4  ;;  %s375_s16 = scalar_lea.sflag (!%p148_p9), [#allocation3], %s782_s10  ;;  %s405_s4 = int_to_ptr.hbm [resolvable:$true] %s800_s4 }
  0x15   : > { %v199_v0 = vld [vmem:[%s852_s1 + $0x18] sm:$0xff]  ;;  %v198_v1 = vld [vmem:[%s852_s1 + $0x10] sm:$0xff]  ;;  %v197_v2 = vld [vmem:[%s852_s1 + $0x8] sm:$0xff]  ;;  %s862_s28 = smov (!%p175_p10, %s491_s28), 63  ;;  %vm200_vm0 = vcmask 261120  }
  0x16   : > { %261 = vmatpush.msra.mxu0 %v199_v0  ;;  %511 = vmatpush.msra.mxu1 %v199_v0  ;;  %v196_v3 = vld [vmem:[%s852_s1] sm:$0xff]  ;;  %s492_s6 = sshll.u32 %s862_s28, 3  ;;  %s795_s28 = sshll.u32 %s387_s19, 4  ;;  %s392_s28 = int_to_ptr.hbm [resolvable:$true] %s795_s28 }
  0x17   : > { %512 = vmatpush.msra.mxu2 %v199_v0  ;;  %513 = vmatpush.msra.mxu3 %v199_v0  ;;  %s747_s9 = scalar_lea.vmem %s851_s0, %s492_s6  ;;  %s581_s5 = sshra.s32 %s392_s28, 4  ;;  %s582_s5 = int_to_ptr.hbm [resolvable:$true] %s581_s5 }
  0x18   : > { %262 = vmatpush.msra.mxu0 %v198_v1  ;;  %514 = vmatpush.msra.mxu1 %v198_v1  ;;  %v180_v4 = vld [vmem:[%s747_s9] sm:$0xff]  ;;  %v181_v8 = vld [vmem:[%s747_s9 + $0x8] sm:$0xff]  ;;  %v182_v12 = vld [vmem:[%s747_s9 + $0x10] sm:$0xff]  ;;  %s583_s6 = scalar_lea.hbm %s582_s5, 1  ;;  %p588_p0 = scmp.lt.s32.totalorder %s582_s5, %s853_s2 }
  0x19   : > { %515 = vmatpush.msra.mxu2 %v198_v1  ;;  %516 = vmatpush.msra.mxu3 %v198_v1  ;;  %v184_v5 = vld [vmem:[%s747_s9 + $0x20] sm:$0xff]  ;;  %v185_v9 = vld [vmem:[%s747_s9 + $0x28] sm:$0xff]  ;;  %v186_v13 = vld [vmem:[%s747_s9 + $0x30] sm:$0xff]  ;;  %p584_p11 = scmp.ne.s32.totalorder %s582_s5, %s583_s6 }
  0x1a   : > { %263 = vmatpush.msra.mxu0 %v197_v2  ;;  %517 = vmatpush.msra.mxu1 %v197_v2  ;;  %v188_v6 = vld [vmem:[%s747_s9 + $0x40] sm:$0xff]  ;;  %v189_v10 = vld [vmem:[%s747_s9 + $0x48] sm:$0xff]  ;;  %v190_v14 = vld [vmem:[%s747_s9 + $0x50] sm:$0xff] }
  0x1b   : > { %518 = vmatpush.msra.mxu2 %v197_v2  ;;  %519 = vmatpush.msra.mxu3 %v197_v2  ;;  %v192_v7 = vld [vmem:[%s747_s9 + $0x60] sm:$0xff]  ;;  %v193_v11 = vld [vmem:[%s747_s9 + $0x68] sm:$0xff]  ;;  %v194_v15 = vld [vmem:[%s747_s9 + $0x70] sm:$0xff]  ;;  %p585_p12 = pnand %p584_p11, %p721_p5 }
  0x1c   : > { %264 = vmatpush.msra.mxu0 %v196_v3  ;;  %520 = vmatpush.msra.mxu1 %v196_v3  ;;  %v183_v16 = vld [vmem:[%s747_s9 + $0x18] sm:$0xff] }
  0x1d   : > { %493 = vmatmul.msk.f32.vlgmr.msra.gmra.mxu0 %vm200_vm0, %v180_v4  ;;  %497 = vmatmul.msk.f32.vlgmr.msra.gmra.mxu1 %vm200_vm0, %v184_v5  ;;  %v187_v17 = vld [vmem:[%s747_s9 + $0x38] sm:$0xff]  ;;  %p586_p13 = pneg %p585_p12 }
  0x1e   : > { %521 = vmatpush.msra.mxu2 %v196_v3  ;;  %522 = vmatpush.msra.mxu3 %v196_v3  ;;  %v191_v18 = vld [vmem:[%s747_s9 + $0x58] sm:$0xff] }
  0x1f   : > { %501 = vmatmul.msk.f32.vlgmr.msra.gmra.mxu2 %vm200_vm0, %v188_v6  ;;  %505 = vmatmul.msk.f32.vlgmr.msra.gmra.mxu3 %vm200_vm0, %v192_v7  ;;  %v195_v19 = vld [vmem:[%s747_s9 + $0x78] sm:$0xff]  ;;  %s587_s9 = scalar_lea.hbm %s853_s2, 4 }
  0x20   : > { %p589_p1 = scmp.lt.s32.totalorder %s587_s9, %s583_s6 }
  0x22   : > { %p590_p2 = por %p589_p1, %p588_p0 }
  0x24   : > { %p591_p3 = pnand %p590_p2, %p586_p13 }
  0x25   : > { %494 = vmatmul.msk.f32.gmra.mxu0 %vm200_vm0, %v181_v8  ;;  %498 = vmatmul.msk.f32.gmra.mxu1 %vm200_vm0, %v185_v9 }
  0x27   : > { %502 = vmatmul.msk.f32.gmra.mxu2 %vm200_vm0, %v189_v10  ;;  %506 = vmatmul.msk.f32.gmra.mxu3 %vm200_vm0, %v193_v11 }
  0x2d   : > { %495 = vmatmul.msk.f32.gmra.mxu0 %vm200_vm0, %v182_v12  ;;  %499 = vmatmul.msk.f32.gmra.mxu1 %vm200_vm0, %v186_v13 }
  0x2f   : > { %503 = vmatmul.msk.f32.gmra.mxu2 %vm200_vm0, %v190_v14  ;;  %507 = vmatmul.msk.f32.gmra.mxu3 %vm200_vm0, %v194_v15 }
  0x35   : > { %496 = vmatmul.msk.f32.gmra.mxu0 %vm200_vm0, %v183_v16  ;;  %500 = vmatmul.msk.f32.gmra.mxu1 %vm200_vm0, %v187_v17 }
  0x37   : > { %504 = vmatmul.msk.f32.gmra.mxu2 %vm200_vm0, %v191_v18  ;;  %508 = vmatmul.msk.f32.gmra.mxu3 %vm200_vm0, %v195_v19 }
  0x9a   : > { %v266_v20 = vpop.f32.mrf.mxu0  ;;  %v278_v21 = vpop.f32.mrf.mxu1 }
  0x9b   : > { %v336_v30 = vmul.f32 %v266_v20, %v266_v20  ;;  %v340_v41 = vmul.f32 %v278_v21, %v278_v21 }
  0xa2   : > { %v269_v22 = vpop.f32.mrf.mxu0  ;;  %v281_v23 = vpop.f32.mrf.mxu1 }
  0xa3   : > { %v290_v24 = vpop.f32.mrf.mxu2  ;;  %v302_v25 = vpop.f32.mrf.mxu3  ;;  %v337_v29 = vmul.f32 %v269_v22, %v269_v22  ;;  %v314_v31 = vadd.f32 %v269_v22, %v266_v20  ;;  %v341_v45 = vmul.f32 %v281_v23, %v281_v23 }
  0xa4   : > { %v344_v55 = vmul.f32 %v290_v24, %v290_v24  ;;  %v348_v4 = vmul.f32 %v302_v25, %v302_v25 }
  0xa5   : > { %v352_v33 = vadd.f32 %v337_v29, %v336_v30 }
  0xaa   : > { %v272_v26 = vpop.f32.mrf.mxu0  ;;  %v284_v28 = vpop.f32.mrf.mxu1 }
  0xab   : > { %v293_v27 = vpop.f32.mrf.mxu2  ;;  %v338_v32 = vmul.f32 %v272_v26, %v272_v26  ;;  %v315_v34 = vadd.f32 %v314_v31, %v272_v26  ;;  %v305_v36 = vpop.f32.mrf.mxu3  ;;  %v342_v49 = vmul.f32 %v284_v28, %v284_v28 }
  0xac   : > { %v345_v59 = vmul.f32 %v293_v27, %v293_v27  ;;  %v349_v8 = vmul.f32 %v305_v36, %v305_v36 }
  0xad   : > { %v353_v37 = vadd.f32 %v352_v33, %v338_v32 }
  0xb2   : > { %v275_v35 = vpop.f32.mrf.mxu0  ;;  %v287_v44 = vpop.f32.mrf.mxu1 }
  0xb3   : > { %v316_v38 = vadd.f32 %v315_v34, %v275_v35  ;;  %v339_v39 = vmul.f32 %v275_v35, %v275_v35  ;;  %v296_v40 = vpop.f32.mrf.mxu2  ;;  %v343_v51 = vmul.f32 %v287_v44, %v287_v44  ;;  %v308_v54 = vpop.f32.mrf.mxu3 }
  0xb4   : > { %v346_v63 = vmul.f32 %v296_v40, %v296_v40  ;;  %v350_v12 = vmul.f32 %v308_v54, %v308_v54 }
  0xb5   : > { %v317_v42 = vadd.f32 %v316_v38, %v278_v21  ;;  %v354_v43 = vadd.f32 %v353_v37, %v339_v39 }
  0xb7   : > { %v355_v46 = vadd.f32 %v354_v43, %v340_v41  ;;  %v318_v47 = vadd.f32 %v317_v42, %v281_v23 }
  0xb9   : > { %v319_v48 = vadd.f32 %v318_v47, %v284_v28  ;;  %v356_v50 = vadd.f32 %v355_v46, %v341_v45 }
  0xbb   : > { %v357_v52 = vadd.f32 %v356_v50, %v342_v49  ;;  %v320_v53 = vadd.f32 %v319_v48, %v287_v44  ;;  %v299_v58 = vpop.f32.mrf.mxu2  ;;  %v311_v7 = vpop.f32.mrf.mxu3 }
  0xbc   : > { %v347_v1 = vmul.f32 %v299_v58, %v299_v58  ;;  %v351_v14 = vmul.f32 %v311_v7, %v311_v7 }
  0xbd   : > { %v321_v56 = vadd.f32 %v320_v53, %v290_v24  ;;  %v358_v57 = vadd.f32 %v357_v52, %v343_v51 }
  0xbf   : > { %v359_v60 = vadd.f32 %v358_v57, %v344_v55  ;;  %v322_v61 = vadd.f32 %v321_v56, %v293_v27 }
  0xc1   : > { %v323_v62 = vadd.f32 %v322_v61, %v296_v40  ;;  %v360_v0 = vadd.f32 %v359_v60, %v345_v59 }
  0xc3   : > { %v361_v2 = vadd.f32 %v360_v0, %v346_v63  ;;  %v324_v3 = vadd.f32 %v323_v62, %v299_v58 }
  0xc5   : > { %v325_v5 = vadd.f32 %v324_v3, %v302_v25  ;;  %v362_v6 = vadd.f32 %v361_v2, %v347_v1 }
  0xc7   : > { %v363_v9 = vadd.f32 %v362_v6, %v348_v4  ;;  %v326_v10 = vadd.f32 %v325_v5, %v305_v36 }
  0xc9   : > { %v327_v11 = vadd.f32 %v326_v10, %v308_v54  ;;  %v364_v13 = vadd.f32 %v363_v9, %v349_v8 }
  0xcb   : > { %v365_v15 = vadd.f32 %v364_v13, %v350_v12  ;;  %v328_v16 = vadd.f32 %v327_v11, %v311_v7 }
  0xcd   : > { %v329_v17 = vrot.slane %v328_v16, 4  ;;  %v366_v18 = vadd.f32 %v365_v15, %v351_v14 }
  0xcf   : > { %v330_v19 = vadd.f32 %v329_v17, %v328_v16  ;;  %v367_v20 = vrot.slane %v366_v18, 4 }
  0xd1   : > { %v331_v21 = vrot.slane %v330_v19, 2  ;;  %v368_v22 = vadd.f32 %v367_v20, %v366_v18 }
  0xd3   : > { %v332_v23 = vadd.f32 %v331_v21, %v330_v19  ;;  %v369_v24 = vrot.slane %v368_v22, 2 }
  0xd5   : > { %v333_v25 = vrot.slane %v332_v23, 1  ;;  %v370_v26 = vadd.f32 %v369_v24, %v368_v22 }
  0xd7   : > { %v334_v27 = vadd.f32 %v333_v25, %v332_v23  ;;  %v371_v28 = vrot.slane %v370_v26, 1 }
  0xd9   : > { %335 = vst [vmem:[%s167_s26] sm:$0x1] %v334_v27  ;;  %v372_v29 = vadd.f32 %v371_v28, %v370_v26 }
  0xda   : > { %594 = shalt.err (!%p591_p3)
}
  0xdb   : > { %523 = dma.vmem_to_hbm [thread:$0]  (%p721_p5), %s390_s27, 16, %s392_s28, %s375_s16   ;;  %373 = vst [vmem:[%s173_s29] sm:$0x1] %v372_v29 }
  0xdc   : > { %s379_s19 = scalar_lea.sflag [#allocation5], %s782_s10  ;;  %s609_s20 = sshra.s32 %s405_s4, 4  ;;  %s610_s20 = int_to_ptr.hbm [resolvable:$true] %s609_s20 }
  0xdd   : > { %s611_s24 = scalar_lea.hbm %s610_s20, 1  ;;  %s615_s5 = scalar_lea.hbm %s854_s3, 4 }
  0xde   : > { %p612_p4 = scmp.ne.s32.totalorder %s610_s20, %s611_s24  ;;  %p616_p9 = scmp.lt.s32.totalorder %s610_s20, %s854_s3 }
  0xdf   : > { %p617_p10 = scmp.lt.s32.totalorder %s615_s5, %s611_s24 }
  0xe0   : > { %p613_p7 = pnand %p612_p4, %p721_p5 }
  0xe1   : > { %p618_p11 = por %p617_p10, %p616_p9 }
  0xe2   : > { %p614_p8 = pneg %p613_p7 }
  0xe4   : > { %p619_p12 = pnand %p618_p11, %p614_p8 }
  0xe6   : > { %622 = shalt.err (!%p619_p12)
}
  0xe7   : > { %524 = dma.vmem_to_hbm [thread:$0]  (%p721_p5), %s403_s30, 16, %s405_s4, %s379_s19  }
  0xe8 PF: > { %p534_p13 = scmp.ge.s32.totalorder %s661_s15, 2  ;;  %s416_s10 = sand.u32 1, %s649_s12  }
  0xe9   : > { %s417_s27 = scalar_lea.sflag [#allocation3], %s416_s10 }
  0xea   : > { %p528_p0 = pnand %p534_p13, %p725_p6 }
  0xec   : > { %p529_p1 = pneg %p528_p0 }
  0xee   : > { %640 = dma.done.wait (%p529_p1), %s417_s27, 16  }
  0xef   : > { %642 = vsyncadd (%p529_p1), %s417_s27, 4294967280  ;;  %s426_s28 = scalar_lea.sflag [#allocation5], %s416_s10 }
  0xf0   : > { %644 = dma.done.wait (%p529_p1), %s426_s28, 16  }
  0xf1   : > { %646 = vsyncadd (%p529_p1), %s426_s28, 4294967280  ;;  %p17_p5 = scmp.ge.s32.totalorder %s708_s18, 6   ;;  %s857_s12 = smov %s653_s13 }
  0xf2   : > { %s858_s13 = smov %s657_s14  ;;  %s859_s14 = smov %s719_s21 }
  0xf3   : > { %s860_s15 = smov %s708_s18  ;;  %19 = sbr.rel (!%p17_p5) target bundleno = 5 (0x5), region = 80 }
  0xf8   :  { %431 = vsyncpa [#allocation3], 1 }
  0xf9   :  { %433 = vsyncpa [#allocation3 + $0x1], 1 }
  0xfa   :  { %434 = vsyncpa [#allocation5], 1 }
  0xfb   :  { %436 = vsyncpa [#allocation5 + $0x1], 1 }

</bundles_post_ra>
